<compile_context>
chip_gen: v7x
topology: tpu7x:2x2x1
jax: 0.10.0
libtpu: 0.0.40
codegen_flags: <defaults>
</compile_context>

<pallas_src>
import jax
import jax.numpy as jnp
from jax.experimental import pallas as pl
from jax.experimental.pallas import tpu as pltpu


def _round_up(x: int, m: int) -> int:
    return (x + m - 1) // m * m


def _narrow_matmul_kernel(x_ref, w_ref, b_ref, o_ref, acc_ref):
    """One (class_tile, feature_tile) grid step of  out = x @ W_sel + b_sel.

    Grid = (num_class_tiles, num_feature_tiles); the feature axis is the
    reduction axis (last, "arbitrary"); the class axis is "parallel".
    """
    f = pl.program_id(1)

    @pl.when(f == 0)
    def _():
        acc_ref[...] = jnp.zeros_like(acc_ref)

    acc_ref[...] += jnp.dot(
        x_ref[...], w_ref[...], preferred_element_type=jnp.float32
    )

    @pl.when(f == pl.num_programs(1) - 1)
    def _():
        o_ref[...] = (acc_ref[...] + b_ref[...]).astype(o_ref.dtype)


def narrow_model_forward(x_nchw, w_verb, b_verb, verb_idxs):
    """Pallas forward for NarrowModel on top of the synthetic (linear) wide model.

    x_nchw:    [B, C, H, W] f32
    w_verb:    [F, Nv] f32   (verb head of the wide model)
    b_verb:    [1, Nv] f32
    verb_idxs: [K] int32     (narrowing indices)
    returns:   [B, K] f32  == (x.flatten(1) @ w_verb + b_verb)[:, verb_idxs]
    """
    batch = x_nchw.shape[0]
    x = x_nchw.reshape(batch, -1).astype(jnp.float32)  # torch-compatible row-major flatten
    feat = x.shape[1]
    k_sel = verb_idxs.shape[0]

    # Fold the narrowing into the weight (verb_idxs selection is a column gather
    # of a linear head, so this is exact).  Done once in XLA, outside the kernel.
    w_sel = jnp.take(w_verb, verb_idxs, axis=1).astype(jnp.float32)   # [F, K]
    b_sel = jnp.take(b_verb, verb_idxs, axis=1).astype(jnp.float32)   # [1, K]

    # ---- padding for TPU-friendly tiles ---------------------------------
    tile_f = min(512, _round_up(feat, 128))          # reduction tile (mult. of 128)
    feat_p = _round_up(feat, tile_f)
    k_p = _round_up(k_sel, 128)                      # lane-dense output
    tile_k = min(256, k_p)                           # class tile (mult. of 128)
    batch_p = _round_up(batch, 8)                    # f32 sublane alignment

    x_p = jnp.zeros((batch_p, feat_p), jnp.float32).at[:batch, :feat].set(x)
    w_p = jnp.zeros((feat_p, k_p), jnp.float32).at[:feat, :k_sel].set(w_sel)
    b_p = jnp.zeros((1, k_p), jnp.float32).at[:, :k_sel].set(b_sel)

    grid = (k_p // tile_k, feat_p // tile_f)

    out_p = pl.pallas_call(
        _narrow_matmul_kernel,
        out_shape=jax.ShapeDtypeStruct((batch_p, k_p), jnp.float32),
        grid=grid,
        in_specs=[
            pl.BlockSpec((batch_p, tile_f), lambda j, f: (0, f)),   # x
            pl.BlockSpec((tile_f, tile_k), lambda j, f: (f, j)),    # W_sel
            pl.BlockSpec((1, tile_k), lambda j, f: (0, j)),         # b_sel
        ],
        out_specs=pl.BlockSpec((batch_p, tile_k), lambda j, f: (0, j)),
        scratch_shapes=[pltpu.VMEM((batch_p, tile_k), jnp.float32)],
        compiler_params=pltpu.CompilerParams(
            dimension_semantics=("parallel", "arbitrary"),
        ),
    )(x_p, w_p, b_p)

    return out_p[:batch, :k_sel]


narrow_model_forward = jax.jit(narrow_model_forward)


if __name__ == "__main__":
    # Small, deterministic shapes.
    B, C, H, W = 2, 4, 16, 16
    FEAT = C * H * W            # 1024
    N_VERB = 128
    VERB_IDXS = jnp.array([3, 7, 11, 19, 23, 31, 42, 55,
                           64, 71, 80, 91, 99, 105, 117, 126], dtype=jnp.int32)

    key = jax.random.PRNGKey(0)
    kx, kwv, kbv = jax.random.split(key, 3)

    x = jax.random.normal(kx, (B, C, H, W), dtype=jnp.float32)
    w_verb = jax.random.normal(kwv, (FEAT, N_VERB), dtype=jnp.float32) * 0.02
    b_verb = jax.random.normal(kbv, (1, N_VERB), dtype=jnp.float32) * 0.02
    # NOTE: the noun head of the wide model is never materialized — its logits
    # are discarded by NarrowModel.forward, so it is pure waste to compute it.

    out = narrow_model_forward(x, w_verb, b_verb, VERB_IDXS)
    out = jax.block_until_ready(out)

    # Pure-JAX reference of the wide (verb) head + narrowing.
    x_flat = x.reshape(B, -1)
    verb_ref = x_flat @ w_verb + b_verb
    ref = verb_ref[:, VERB_IDXS]

    assert out.shape == (B, VERB_IDXS.shape[0]), out.shape
    assert jnp.allclose(out, ref, atol=1e-4, rtol=1e-4), float(jnp.max(jnp.abs(out - ref)))
    print("KERNEL_OK")
</pallas_src>

<mosaic_0001>
module attributes {stable_mosaic.version = 11 : i64} {
  func.func @_narrow_matmul_kernel(%arg0: i32, %arg1: i32, %arg2: memref<8x512xf32, #tpu.memory_space<vmem>>, %arg3: memref<512x128xf32, #tpu.memory_space<vmem>>, %arg4: memref<1x128xf32, #tpu.memory_space<vmem>>, %arg5: memref<8x128xf32, #tpu.memory_space<vmem>>, %arg6: memref<8x128xf32, #tpu.memory_space<vmem>>) attributes {dimension_semantics = [#tpu.dimension_semantics<parallel>, #tpu.dimension_semantics<arbitrary>], iteration_bounds = array<i64: 1, 2>, scalar_prefetch = 0 : i64, scratch_operands = 1 : i64, tpu.core_type = #tpu.core_type<tc>, window_params = [{transform_indices = @transform_0, window_bounds = array<i64: 8, 512>}, {transform_indices = @transform_1, window_bounds = array<i64: 512, 128>}, {transform_indices = @transform_2, window_bounds = array<i64: 1, 128>}, {transform_indices = @transform_3, window_bounds = array<i64: 8, 128>}]} {
    %c0_i32 = arith.constant 0 : i32
    %0 = arith.cmpi eq, %arg1, %c0_i32 : i32
    %1 = arith.extui %0 : i1 to i32
    %c0_i32_0 = arith.constant 0 : i32
    %2 = arith.cmpi ne, %1, %c0_i32_0 : i32
    scf.if %2 {
      %cst_9 = arith.constant 0.000000e+00 : f32
      %12 = vector.broadcast %cst_9 : f32 to vector<8x128xf32>
      %c0_10 = arith.constant 0 : index
      %c0_11 = arith.constant 0 : index
      %13 = vector.load %arg6[%c0_10, %c0_11] : memref<8x128xf32, #tpu.memory_space<vmem>>, vector<8x128xf32>
      tpu.vector_store %arg6[%c0_10, %c0_11], %12 {strides = array<i32>} : memref<8x128xf32, #tpu.memory_space<vmem>>, vector<8x128xf32>,
    } else {
    }
    %c0 = arith.constant 0 : index
    %c0_1 = arith.constant 0 : index
    %3 = vector.load %arg6[%c0, %c0_1] : memref<8x128xf32, #tpu.memory_space<vmem>>, vector<8x128xf32>
    %c0_2 = arith.constant 0 : index
    %c0_3 = arith.constant 0 : index
    %4 = vector.load %arg2[%c0_2, %c0_3] : memref<8x512xf32, #tpu.memory_space<vmem>>, vector<8x512xf32>
    %c0_4 = arith.constant 0 : index
    %c0_5 = arith.constant 0 : index
    %5 = vector.load %arg3[%c0_4, %c0_5] : memref<512x128xf32, #tpu.memory_space<vmem>>, vector<512x128xf32>
    %cst = arith.constant dense<0.000000e+00> : vector<8x128xf32>
    %6 = tpu.matmul %4, %5, %cst {dimension_numbers = #tpu.dot_dimension_numbers<[1], [0], [0], [1], [0, 0, 1, 1], [], []>} : vector<8x512xf32>, vector<512x128xf32>, vector<8x128xf32> -> vector<8x128xf32>
    %7 = arith.addf %3, %6 : vector<8x128xf32>
    %c0_6 = arith.constant 0 : index
    %c0_7 = arith.constant 0 : index
    %8 = vector.load %arg6[%c0_6, %c0_7] : memref<8x128xf32, #tpu.memory_space<vmem>>, vector<8x128xf32>
    tpu.vector_store %arg6[%c0_6, %c0_7], %7 {strides = array<i32>} : memref<8x128xf32, #tpu.memory_space<vmem>>, vector<8x128xf32>,
    %c1_i32 = arith.constant 1 : i32
    %9 = arith.cmpi eq, %arg1, %c1_i32 : i32
    %10 = arith.extui %9 : i1 to i32
    %c0_i32_8 = arith.constant 0 : i32
    %11 = arith.cmpi ne, %10, %c0_i32_8 : i32
    scf.if %11 {
      %c0_9 = arith.constant 0 : index
      %c0_10 = arith.constant 0 : index
      %12 = vector.load %arg6[%c0_9, %c0_10] : memref<8x128xf32, #tpu.memory_space<vmem>>, vector<8x128xf32>
      %c0_11 = arith.constant 0 : index
      %c0_12 = arith.constant 0 : index
      %13 = vector.load %arg4[%c0_11, %c0_12] : memref<1x128xf32, #tpu.memory_space<vmem>>, vector<1x128xf32>
      %14 = vector.broadcast %13 : vector<1x128xf32> to vector<8x128xf32>
      %15 = arith.addf %12, %14 : vector<8x128xf32>
      %c0_13 = arith.constant 0 : index
      %c0_14 = arith.constant 0 : index
      %16 = vector.load %arg5[%c0_13, %c0_14] : memref<8x128xf32, #tpu.memory_space<vmem>>, vector<8x128xf32>
      tpu.vector_store %arg5[%c0_13, %c0_14], %15 {strides = array<i32>} : memref<8x128xf32, #tpu.memory_space<vmem>>, vector<8x128xf32>,
    } else {
    }
    return
  }
  func.func @transform_0(%arg0: i32, %arg1: i32) -> (i32, i32) {
    %c0_i32 = arith.constant 0 : i32
    %c0_i32_0 = arith.constant 0 : i32
    return %c0_i32, %arg1 : i32, i32
  }
  func.func @transform_1(%arg0: i32, %arg1: i32) -> (i32, i32) {
    %c0_i32 = arith.constant 0 : i32
    return %arg1, %arg0 : i32, i32
  }
  func.func @transform_2(%arg0: i32, %arg1: i32) -> (i32, i32) {
    %c0_i32 = arith.constant 0 : i32
    %c0_i32_0 = arith.constant 0 : i32
    return %c0_i32, %arg0 : i32, i32
  }
  func.func @transform_3(%arg0: i32, %arg1: i32) -> (i32, i32) {
    %c0_i32 = arith.constant 0 : i32
    %c0_i32_0 = arith.constant 0 : i32
    return %c0_i32, %arg0 : i32, i32
  }
}

</mosaic_0001>

<bundles_post_ra>
// kernel: narrow_model_forward.1
= control target key start
LH: loop header
LB: loop body
LE: loop exit
PB: predicated region body
PF: predicated region fallthrough
CT: control target
= control target key end

     0   :  { %s765_s12 = smov 0   ;;  %s767_s13 = smov 0   ;;  %s882_s0 = inlined_call_operand.vmem [shape: f32[8,1024], index: 0, kind: input, shape index: {}]   ;;  %s883_s1 = inlined_call_operand.vmem [shape: f32[1024,128], index: 1, kind: input, shape index: {}]   ;;  %s884_s2 = inlined_call_operand.vmem [shape: f32[1,128], index: 2, kind: input, shape index: {}]   ;;  %s885_s3 = inlined_call_operand.vmem [shape: f32[8,128], index: 3, kind: output, shape index: {}]  }
   0x1   :  { %s769_s14 = smov 0  }
   0x2 LB: > { %s22_s15 = sadd.s32 1, %s738_s13  ;;  %p550_p0 = scmp.ge.s32.totalorder %s742_s14, 1  ;;  %s742_s14 = sphi %s769_s14, %s13_s14   ;;  %s738_s13 = sphi %s767_s13, %s887_s13   ;;  %s734_s12 = sphi %s765_s12, %s886_s12  }
   0x3   : > { %p23_p1 = scmp.ge.s32.totalorder %s22_s15, 2  ;;  %p174_p2 = scmp.lt.s32.totalorder %s742_s14, 3 }
   0x5   : > { %s889_s15 = smov (%p23_p1, %s22_s15), 0  ;;  %p175_p3 = pnand %p550_p0, %p174_p2 }
   0x6   : > { %s551_s16 = sshll.u32 (!%p175_p3), %s734_s12, 2  ;;  %s553_s17 = sshll.u32 (!%p175_p3), %s734_s12, 6 }
   0x7   : > { %178 = sbr.rel (%p175_p3) target bundleno = 291 (0x123), region = 32  ;;  %p209_p4 = scmp.lt.s32.totalorder (!%p175_p3), %s551_s16, 7 }
   0x8   : > { %p215_p5 = scmp.lt.s32.totalorder (!%p175_p3), %s553_s17, 127  ;;  %p555_p6 = scmp.ne.s32.totalorder (!%p175_p3), %s734_s12, 0 }
   0xe   : > { %s891_s16 = smov (!%p209_p4, %s551_s16), 7  ;;  %s893_s17 = smov (!%p215_p5, %s553_s17), 127 }
   0xf   : > { %s552_s18 = sshll.u32 %s891_s16, 3  ;;  %s554_s22 = sshll.u32 %s893_s17, 3  ;;  %v744_v0 = vmov (!%p555_p6), 0.0  }
  0x10   : > { %s790_s21 = scalar_lea.vmem %s882_s0, %s552_s18  ;;  %s795_s25 = scalar_lea.vmem %s883_s1, %s554_s22  ;;  %234 = vst [vmem:[#allocation2] sm:$0xff] (!%p555_p6), %v744_v0 }
  0x11   : > { %233 = sbr.rel (%p555_p6) target bundleno = 24 (0x18), region = 36 }
  0x18 PF: > { %v256_v1 = vld [vmem:[%s795_s25 + $0x80] sm:$0xff]  ;;  %v257_v2 = vld [vmem:[%s795_s25 + $0x88] sm:$0xff]  ;;  %v258_v12 = vld [vmem:[%s795_s25 + $0x90] sm:$0xff]  ;;  %p556_p7 = scmp.ne.s32.totalorder %s734_s12, 1 }
  0x19   : > { %v288_v3 = vld [vmem:[%s795_s25 + $0x180] sm:$0xff]  ;;  %v631_v4 = vpack.c.bf16 %v257_v2, %v256_v1  ;;  %v289_v5 = vld [vmem:[%s795_s25 + $0x188] sm:$0xff]  ;;  %v259_v14 = vld [vmem:[%s795_s25 + $0x98] sm:$0xff] }
  0x1a   : > { %v240_v6 = vld [vmem:[%s795_s25] sm:$0xff]  ;;  %v241_v7 = vld [vmem:[%s795_s25 + $0x8] sm:$0xff]  ;;  %v663_v8 = vpack.c.bf16 %v289_v5, %v288_v3  ;;  %v290_v15 = vld [vmem:[%s795_s25 + $0x190] sm:$0xff]  ;;  %v635_v17 = vpack.c.bf16 %v259_v14, %v258_v12 }
  0x1b   : > { %v633_v9 = vpack.c.bf16 %v241_v7, %v240_v6  ;;  %v272_v10 = vld [vmem:[%s795_s25 + $0x100] sm:$0xff]  ;;  %v273_v11 = vld [vmem:[%s795_s25 + $0x108] sm:$0xff]  ;;  %632 = vmatprep.subr.bf16.mxu0 %v631_v4  ;;  %v291_v16 = vld [vmem:[%s795_s25 + $0x198] sm:$0xff] }
  0x1c   : > { %v665_v13 = vpack.c.bf16 %v273_v11, %v272_v10  ;;  %664 = vmatprep.subr.bf16.mxu1 %v663_v8  ;;  %v667_v18 = vpack.c.bf16 %v291_v16, %v290_v15  ;;  %v242_v19 = vld [vmem:[%s795_s25 + $0x10] sm:$0xff]  ;;  %v243_v20 = vld [vmem:[%s795_s25 + $0x18] sm:$0xff]  ;;  %v260_v24 = vld [vmem:[%s795_s25 + $0xa0] sm:$0xff] }
  0x1d   : > { %634 = vmatpush3.bf16.msra.mxu0 %v633_v9  ;;  %v274_v21 = vld [vmem:[%s795_s25 + $0x110] sm:$0xff]  ;;  %v637_v22 = vpack.c.bf16 %v243_v20, %v242_v19  ;;  %v275_v23 = vld [vmem:[%s795_s25 + $0x118] sm:$0xff]  ;;  %v261_v25 = vld [vmem:[%s795_s25 + $0xa8] sm:$0xff] }
  0x1e   : > { %666 = vmatpush3.bf16.msra.mxu1 %v665_v13  ;;  %636 = vmatprep.subr.bf16.mxu0 %v635_v17  ;;  %v669_v26 = vpack.c.bf16 %v275_v23, %v274_v21  ;;  %v639_v27 = vpack.c.bf16 %v261_v25, %v260_v24  ;;  %v292_v28 = vld [vmem:[%s795_s25 + $0x1a0] sm:$0xff]  ;;  %v293_v29 = vld [vmem:[%s795_s25 + $0x1a8] sm:$0xff]  ;;  %v262_v36 = vld [vmem:[%s795_s25 + $0xb0] sm:$0xff] }
  0x1f   : > { %668 = vmatprep.subr.bf16.mxu1 %v667_v18  ;;  %v244_v30 = vld [vmem:[%s795_s25 + $0x20] sm:$0xff]  ;;  %v671_v31 = vpack.c.bf16 %v293_v29, %v292_v28  ;;  %v245_v32 = vld [vmem:[%s795_s25 + $0x28] sm:$0xff]  ;;  %v263_v37 = vld [vmem:[%s795_s25 + $0xb8] sm:$0xff] }
  0x20   : > { %v276_v33 = vld [vmem:[%s795_s25 + $0x120] sm:$0xff]  ;;  %v277_v34 = vld [vmem:[%s795_s25 + $0x128] sm:$0xff]  ;;  %v641_v35 = vpack.c.bf16 %v245_v32, %v244_v30  ;;  %v294_v38 = vld [vmem:[%s795_s25 + $0x1b0] sm:$0xff]  ;;  %v643_v40 = vpack.c.bf16 %v263_v37, %v262_v36 }
  0x21   : > { %638 = vmatpush3.bf16.msra.mxu0 %v637_v22  ;;  %v673_v39 = vpack.c.bf16 %v277_v34, %v276_v33  ;;  %v295_v41 = vld [vmem:[%s795_s25 + $0x1b8] sm:$0xff]  ;;  %v246_v42 = vld [vmem:[%s795_s25 + $0x30] sm:$0xff]  ;;  %v264_v47 = vld [vmem:[%s795_s25 + $0xc0] sm:$0xff] }
  0x22   : > { %670 = vmatpush3.bf16.msra.mxu1 %v669_v26  ;;  %640 = vmatprep.subr.bf16.mxu0 %v639_v27  ;;  %v247_v43 = vld [vmem:[%s795_s25 + $0x38] sm:$0xff]  ;;  %v675_v44 = vpack.c.bf16 %v295_v41, %v294_v38  ;;  %v278_v45 = vld [vmem:[%s795_s25 + $0x130] sm:$0xff]  ;;  %v265_v48 = vld [vmem:[%s795_s25 + $0xc8] sm:$0xff] }
  0x23   : > { %672 = vmatprep.subr.bf16.mxu1 %v671_v31  ;;  %v279_v46 = vld [vmem:[%s795_s25 + $0x138] sm:$0xff]  ;;  %v296_v49 = vld [vmem:[%s795_s25 + $0x1c0] sm:$0xff]  ;;  %v297_v50 = vld [vmem:[%s795_s25 + $0x1c8] sm:$0xff]  ;;  %v645_v51 = vpack.c.bf16 %v247_v43, %v246_v42  ;;  %v647_v53 = vpack.c.bf16 %v265_v48, %v264_v47 }
  0x24   : > { %v677_v52 = vpack.c.bf16 %v279_v46, %v278_v45  ;;  %v248_v54 = vld [vmem:[%s795_s25 + $0x40] sm:$0xff]  ;;  %v249_v55 = vld [vmem:[%s795_s25 + $0x48] sm:$0xff]  ;;  %v679_v57 = vpack.c.bf16 %v297_v50, %v296_v49  ;;  %v266_v59 = vld [vmem:[%s795_s25 + $0xd0] sm:$0xff] }
  0x25   : > { %642 = vmatpush3.bf16.msra.mxu0 %v641_v35  ;;  %v280_v56 = vld [vmem:[%s795_s25 + $0x140] sm:$0xff]  ;;  %v281_v58 = vld [vmem:[%s795_s25 + $0x148] sm:$0xff]  ;;  %v267_v60 = vld [vmem:[%s795_s25 + $0xd8] sm:$0xff]  ;;  %v649_v63 = vpack.c.bf16 %v249_v55, %v248_v54 }
  0x26   : > { %674 = vmatpush3.bf16.msra.mxu1 %v673_v39  ;;  %644 = vmatprep.subr.bf16.mxu0 %v643_v40  ;;  %v298_v61 = vld [vmem:[%s795_s25 + $0x1d0] sm:$0xff]  ;;  %v299_v62 = vld [vmem:[%s795_s25 + $0x1d8] sm:$0xff]  ;;  %v681_v0 = vpack.c.bf16 %v281_v58, %v280_v56  ;;  %v651_v1 = vpack.c.bf16 %v267_v60, %v266_v59  ;;  %v268_v7 = vld [vmem:[%s795_s25 + $0xe0] sm:$0xff] }
  0x27   : > { %676 = vmatprep.subr.bf16.mxu1 %v675_v44  ;;  %v250_v2 = vld [vmem:[%s795_s25 + $0x50] sm:$0xff]  ;;  %v251_v3 = vld [vmem:[%s795_s25 + $0x58] sm:$0xff]  ;;  %v683_v5 = vpack.c.bf16 %v299_v62, %v298_v61  ;;  %v269_v8 = vld [vmem:[%s795_s25 + $0xe8] sm:$0xff] }
  0x28   : > { %v282_v4 = vld [vmem:[%s795_s25 + $0x150] sm:$0xff]  ;;  %v283_v6 = vld [vmem:[%s795_s25 + $0x158] sm:$0xff]  ;;  %v300_v9 = vld [vmem:[%s795_s25 + $0x1e0] sm:$0xff]  ;;  %v653_v11 = vpack.c.bf16 %v251_v3, %v250_v2  ;;  %v655_v15 = vpack.c.bf16 %v269_v8, %v268_v7 }
  0x29   : > { %646 = vmatpush3.bf16.msra.mxu0 %v645_v51  ;;  %v301_v10 = vld [vmem:[%s795_s25 + $0x1e8] sm:$0xff]  ;;  %v252_v12 = vld [vmem:[%s795_s25 + $0x60] sm:$0xff]  ;;  %v685_v14 = vpack.c.bf16 %v283_v6, %v282_v4  ;;  %v239_v18 = vld [vmem:[%s790_s21 + $0x18] sm:$0xff] }
  0x2a   : > { %678 = vmatpush3.bf16.msra.mxu1 %v677_v52  ;;  %648 = vmatprep.subr.bf16.mxu0 %v647_v53  ;;  %v253_v13 = vld [vmem:[%s795_s25 + $0x68] sm:$0xff]  ;;  %v284_v16 = vld [vmem:[%s795_s25 + $0x160] sm:$0xff]  ;;  %v687_v19 = vpack.c.bf16 %v301_v10, %v300_v9  ;;  %v270_v21 = vld [vmem:[%s795_s25 + $0xf0] sm:$0xff] }
  0x2b   : > { %680 = vmatprep.subr.bf16.mxu1 %v679_v57  ;;  %v237_v17 = vld [vmem:[%s790_s21 + $0x8] sm:$0xff]  ;;  %v271_v22 = vld [vmem:[%s795_s25 + $0xf8] sm:$0xff]  ;;  %v302_v23 = vld [vmem:[%s795_s25 + $0x1f0] sm:$0xff]  ;;  %438 = vmatprep.mubr.f32.mxu1 %v239_v18  ;;  %v657_v25 = vpack.c.bf16 %v253_v13, %v252_v12 }
  0x2c   : > { %v285_v20 = vld [vmem:[%s795_s25 + $0x168] sm:$0xff]  ;;  %368 = vmatprep.mubr.f32.mxu0 %v237_v17  ;;  %v303_v24 = vld [vmem:[%s795_s25 + $0x1f8] sm:$0xff]  ;;  %v659_v27 = vpack.c.bf16 %v271_v22, %v270_v21  ;;  %v254_v28 = vld [vmem:[%s795_s25 + $0x70] sm:$0xff] }
  0x2d   : > { %650 = vmatpush3.bf16.msra.mxu0 %v649_v63  ;;  %v689_v26 = vpack.c.bf16 %v285_v20, %v284_v16  ;;  %v255_v29 = vld [vmem:[%s795_s25 + $0x78] sm:$0xff]  ;;  %v691_v30 = vpack.c.bf16 %v303_v24, %v302_v23  ;;  %v286_v31 = vld [vmem:[%s795_s25 + $0x170] sm:$0xff]  ;;  %v236_v35 = vld [vmem:[%s790_s21] sm:$0xff] }
  0x2e   : > { %682 = vmatpush3.bf16.msra.mxu1 %v681_v0  ;;  %652 = vmatprep.subr.bf16.mxu0 %v651_v1  ;;  %v287_v32 = vld [vmem:[%s795_s25 + $0x178] sm:$0xff]  ;;  %v661_v33 = vpack.c.bf16 %v255_v29, %v254_v28  ;;  %v238_v36 = vld [vmem:[%s790_s21 + $0x10] sm:$0xff]  ;;  %v235_v43 = vld [vmem:[#allocation2] sm:$0xff] }
  0x2f   : > { %684 = vmatprep.subr.bf16.mxu1 %v683_v5  ;;  %v693_v34 = vpack.c.bf16 %v287_v32, %v286_v31  ;;  %v557_v47 = vld [vmem:[%s884_s2] ss:$0 sm:$0xff] (!%p556_p7) }
  0x31   : > { %654 = vmatpush3.bf16.msra.mxu0 %v653_v11 }
  0x32   : > { %686 = vmatpush3.bf16.msra.mxu1 %v685_v14  ;;  %656 = vmatprep.subr.bf16.mxu0 %v655_v15 }
  0x33   : > { %688 = vmatprep.subr.bf16.mxu1 %v687_v19 }
  0x35   : > { %658 = vmatpush3.bf16.msra.mxu0 %v657_v25 }
  0x36   : > { %690 = vmatpush3.bf16.msra.mxu1 %v689_v26  ;;  %660 = vmatprep.subr.bf16.mxu0 %v659_v27 }
  0x37   : > { %692 = vmatprep.subr.bf16.mxu1 %v691_v30 }
  0x39   : > { %662 = vmatpush3.bf16.msra.mxu0 %v661_v33 }
  0x3a   : > { %694 = vmatpush3.bf16.msra.mxu1 %v693_v34 }
  0x3c   : > { %369 = vmatmul.mubr.f32.vlgmr.msra.gmra.mrb[0].mxu0 %v236_v35 }
  0x3d   : > { %439 = vmatmul.mubr.f32.vlgmr.msra.gmra.mrb[0].mxu1 %v238_v36 }
 0x10f   : > { %v593_v37 = vpop.f32.mrb[0].mxu0 }
 0x110   : > { %v628_v38 = vpop.f32.mrb[0].mxu1  ;;  %v594_v39 = vpop.f32.mrb[1].mxu0 }
 0x111   : > { %v595_v40 = vadd.f32 %v594_v39, %v593_v37  ;;  %v629_v41 = vpop.f32.mrb[1].mxu1 }
 0x112   : > { %v630_v42 = vadd.f32 %v629_v41, %v628_v38  ;;  %449 = sbr.rel (%p556_p7) target bundleno = 291 (0x123), region = 40 }
 0x114   : > { %v441_v44 = vadd.f32 %v630_v42, %v595_v40 }
 0x116   : > { %v444_v45 = vadd.f32 %v441_v44, %v235_v43 }
 0x118   : > { %445 = vst [vmem:[#allocation2] sm:$0xff] %v444_v45 }
 0x11f   : > { %v450_v46 = vld [vmem:[#allocation2] sm:$0xff] }
 0x120   : > { %v458_v48 = vadd.f32 %v557_v47, %v450_v46 }
 0x122   : > { %459 = vst [vmem:[%s885_s3] sm:$0xff] %v458_v48 }
 0x123 PF: > { %s13_s14 = sadd.s32 1, %s742_s14   ;;  %s886_s12 = smov %s738_s13 }
 0x124   : > { %p10_p8 = scmp.ge.s32.totalorder %s13_s14, 4   ;;  %s887_s13 = smov %s889_s15 }
 0x126   :  { %12 = sbr.rel (!%p10_p8) target bundleno = 2 (0x2), region = 76 }

</bundles_post_ra>
